<compile_context>
chip_gen: v7x
topology: tpu7x:2x2x1
jax: 0.10.0
libtpu: 0.0.40
codegen_flags: <defaults>
</compile_context>

<pallas_src>
import functools
import math

import jax
import jax.numpy as jnp
import numpy as np
from jax.experimental import pallas as pl
from jax.experimental.pallas import tpu as pltpu


def _round_up(a, b):
    return (a + b - 1) // b * b


def _cdiv(a, b):
    return -(-a // b)


# ----------------------------------------------------------------------------
# Kernels.  Block shapes (batch dim squeezed out via None):
#   x_ref : (Cin, TL)   [K=1]            or (Cin, Lp) whole flat image [K>1]
#   w_ref : (Cc, K*K*Cin)   bf16
#   b_ref : (Cc, 1)         f32
#   o_ref : (Cc, TL)
#   col_ref (K>1 scratch): (K*K*Cin, TL) bf16 im2col buffer
# ----------------------------------------------------------------------------
def _conv1x1_kernel(x_ref, w_ref, b_ref, o_ref):
    acc = jnp.dot(w_ref[...], x_ref[...], preferred_element_type=jnp.float32)
    acc = acc + b_ref[...]
    o_ref[...] = acc.astype(o_ref.dtype)


def _conv_im2col_kernel(x_ref, w_ref, b_ref, o_ref, col_ref, *,
                        offsets, c_in, tl):
    base = pl.multiple_of(pl.program_id(1) * tl, 128)
    # Per-tap stores into the VMEM im2col scratch (static sublane offsets).
    for t, off in enumerate(offsets):
        col_ref[pl.ds(t * c_in, c_in), :] = x_ref[:, pl.ds(base + off, tl)]
    acc = jnp.dot(w_ref[...], col_ref[...], preferred_element_type=jnp.float32)
    acc = acc + b_ref[...]
    o_ref[...] = acc.astype(o_ref.dtype)


def _build_call(*, n, c_in, c_conv, kkc, lp, tl, num_tiles, l_out_total,
                kernel_size, offsets, out_dtype, vmem_limit,
                single_buffer_const):
    const_kw = {"pipeline_mode": pl.Buffered(1)} if single_buffer_const else {}
    w_spec = pl.BlockSpec((c_conv, kkc), lambda b, j: (0, 0), **const_kw)
    b_spec = pl.BlockSpec((c_conv, 1), lambda b, j: (0, 0), **const_kw)
    out_spec = pl.BlockSpec((None, c_conv, tl), lambda b, j: (b, 0, j))

    if kernel_size == 1:
        x_spec = pl.BlockSpec((None, c_in, tl), lambda b, j: (b, 0, j))
        kernel = _conv1x1_kernel
        scratch = []
    else:
        # Whole flat (zero-tail-padded) image stays resident per batch element;
        # lane tiles slice it in-kernel (covers the K*K tap halo).
        x_spec = pl.BlockSpec((None, c_in, lp), lambda b, j: (b, 0, 0))
        kernel = functools.partial(_conv_im2col_kernel,
                                   offsets=offsets, c_in=c_in, tl=tl)
        scratch = [pltpu.VMEM((kkc, tl), jnp.bfloat16)]

    cost = pl.CostEstimate(
        flops=2 * n * c_conv * kkc * l_out_total,
        transcendentals=0,
        bytes_accessed=int(2 * n * c_in * lp + 2 * c_conv * kkc + 4 * c_conv
                           + 4 * n * c_conv * l_out_total))

    return pl.pallas_call(
        kernel,
        out_shape=jax.ShapeDtypeStruct((n, c_conv, l_out_total), out_dtype),
        grid_spec=pltpu.PrefetchScalarGridSpec(
            num_scalar_prefetch=0,
            grid=(n, num_tiles),
            in_specs=[x_spec, w_spec, b_spec],
            out_specs=out_spec,
            scratch_shapes=scratch),
        compiler_params=pltpu.CompilerParams(
            dimension_semantics=("parallel", "parallel"),
            vmem_limit_bytes=vmem_limit),
        cost_estimate=cost,
    )


def patch_unembed_forward(x_nchw, weight, bias, *, patch_size, kernel_size=1):
    """Equivalent of PatchUnEmbed.forward.

    x_nchw : (N, embed_dim, H, W)                        float32
    weight : (out_chans*patch_size**2, embed_dim, K, K)  float32 (PyTorch layout)
    bias   : (out_chans*patch_size**2,)                  float32
    returns (N, out_chans, H*patch_size, W*patch_size)
    """
    n, c_in, h, w = x_nchw.shape
    c_conv = weight.shape[0]
    out_chans = c_conv // (patch_size ** 2)
    pad = kernel_size // 2
    out_dtype = x_nchw.dtype

    # --- glue: bf16 cast + reflection padding (no-op for kernel_size=1) ------
    xb = x_nchw.astype(jnp.bfloat16)
    if pad > 0:
        xb = jnp.pad(xb, ((0, 0), (0, 0), (pad, pad), (pad, pad)),
                     mode="reflect")
    hp, wp = h + 2 * pad, w + 2 * pad

    # Tap offsets into the flat padded image (static Python ints).
    offsets = tuple(kh * wp + kw
                    for kh in range(kernel_size) for kw in range(kernel_size))
    max_off = max(offsets)
    l_valid = h * wp                              # valid flat-output extent
    l_out_pad = _round_up(l_valid, 128)

    # Lane tiling: target ~2048 lanes per grid step; keep >=2 grid steps.
    target_tl = 2048
    num_tiles = _cdiv(l_out_pad, target_tl)
    if n == 1 and num_tiles == 1 and l_out_pad >= 256:
        num_tiles = 2                             # keep both v7x TCs busy
    tl = _round_up(_cdiv(l_out_pad, num_tiles), 128)
    l_out_total = tl * num_tiles

    # Flat input extent: must cover every tap read of every lane tile.
    lp = _round_up(max(l_out_total + max_off, hp * wp), 128)
    x_flat = xb.reshape(n, c_in, hp * wp)
    if lp > hp * wp:
        x_flat = jnp.pad(x_flat, ((0, 0), (0, 0), (0, lp - hp * wp)))

    # Weight: (Cc, Cin, K, K) -> (Cc, K, K, Cin) -> (Cc, K*K*Cin), matching the
    # (kh, kw, ci) order of the im2col stack; bf16 for the MXU.
    kkc = kernel_size * kernel_size * c_in
    w_flat = (jnp.transpose(weight, (0, 2, 3, 1))
              .reshape(c_conv, kkc).astype(jnp.bfloat16))
    b_col = bias.reshape(c_conv, 1).astype(jnp.float32)

    # Per-step VMEM budget -> explicit vmem limit with headroom.
    x_block = c_in * (tl if kernel_size == 1 else lp) * 2
    out_block = c_conv * tl * 4
    const_b = c_conv * kkc * 2 + c_conv * 4
    scratch_b = 0 if kernel_size == 1 else kkc * tl * 2
    need = 2 * x_block + 2 * out_block + 2 * const_b + scratch_b
    vmem_limit = int(min(max(3 * need, 32 * 2 ** 20), 48 * 2 ** 20))

    common = dict(n=n, c_in=c_in, c_conv=c_conv, kkc=kkc, lp=lp, tl=tl,
                  num_tiles=num_tiles, l_out_total=l_out_total,
                  kernel_size=kernel_size, offsets=offsets,
                  out_dtype=out_dtype, vmem_limit=vmem_limit)
    try:
        conv_flat = _build_call(single_buffer_const=True,
                                **common)(x_flat, w_flat, b_col)
    except Exception:
        # Fallback if single-buffered pipeline_mode is unsupported.
        conv_flat = _build_call(single_buffer_const=False,
                                **common)(x_flat, w_flat, b_col)

    # --- glue: crop to valid region + PixelShuffle (pure layout) -------------
    conv = conv_flat[:, :, :h * wp].reshape(n, c_conv, h, wp)[:, :, :, :w]
    p = patch_size
    y = conv.reshape(n, out_chans, p, p, h, w)
    y = jnp.transpose(y, (0, 1, 4, 2, 5, 3)).reshape(n, out_chans, h * p, w * p)
    return y


def _reference_forward(x, weight, bias, *, patch_size, kernel_size=1):
    """Pure-JAX f32 reference (lax conv + pixel shuffle)."""
    pad = kernel_size // 2
    xp = x
    if pad > 0:
        xp = jnp.pad(x, ((0, 0), (0, 0), (pad, pad), (pad, pad)),
                     mode="reflect")
    y = jax.lax.conv_general_dilated(
        xp, weight, window_strides=(1, 1), padding="VALID",
        dimension_numbers=("NCHW", "OIHW", "NCHW"),
        precision=jax.lax.Precision.HIGHEST)
    y = y + bias[None, :, None, None]
    n, cpp, h, w = y.shape
    p = patch_size
    c = cpp // (p * p)
    y = y.reshape(n, c, p, p, h, w)
    return jnp.transpose(y, (0, 1, 4, 2, 5, 3)).reshape(n, c, h * p, w * p)


if __name__ == "__main__":
    # Small shapes consistent with the module: batch=2, embed_dim=32, 16x16,
    # patch_size=4, out_chans=3.  Test both the default kernel_size=1 path and
    # the reflect-padded kernel_size=3 path.
    N, EMBED, H, W = 2, 32, 16, 16
    PATCH, OUT_CHANS = 4, 3
    C_CONV = OUT_CHANS * PATCH * PATCH

    base_key = jax.random.PRNGKey(0)

    for ksize in (1, 3):
        kx, kw_, kb = jax.random.split(jax.random.fold_in(base_key, ksize), 3)
        x = jax.random.normal(kx, (N, EMBED, H, W), dtype=jnp.float32)

        fan_in = EMBED * ksize * ksize
        bound = 1.0 / math.sqrt(fan_in)
        weight = jax.random.uniform(kw_, (C_CONV, EMBED, ksize, ksize),
                                    jnp.float32, minval=-bound, maxval=bound)
        bias = jax.random.uniform(kb, (C_CONV,), jnp.float32,
                                  minval=-bound, maxval=bound)

        out = patch_unembed_forward(x, weight, bias,
                                    patch_size=PATCH, kernel_size=ksize)
        out = jax.block_until_ready(out)

        ref = _reference_forward(x, weight, bias,
                                 patch_size=PATCH, kernel_size=ksize)
        ref = jax.block_until_ready(ref)

        assert out.shape == (N, OUT_CHANS, H * PATCH, W * PATCH), out.shape
        # bf16 MXU feed vs. f32 HIGHEST-precision reference -> relaxed tolerance.
        np.testing.assert_allclose(np.asarray(out), np.asarray(ref),
                                   rtol=3e-2, atol=3e-2)

    print("KERNEL_OK")
</pallas_src>

<mosaic_0001>
module attributes {stable_mosaic.version = 11 : i64} {
  func.func @_conv1x1_kernel(%arg0: i32, %arg1: i32, %arg2: memref<1x32x256xbf16, #tpu.memory_space<vmem>>, %arg3: memref<48x32xbf16, #tpu.memory_space<vmem>>, %arg4: memref<48x1xf32, #tpu.memory_space<vmem>>, %arg5: memref<1x48x256xf32, #tpu.memory_space<vmem>>) attributes {dimension_semantics = [#tpu.dimension_semantics<parallel>, #tpu.dimension_semantics<parallel>], iteration_bounds = array<i64: 2, 1>, scalar_prefetch = 0 : i64, scratch_operands = 0 : i64, tpu.core_type = #tpu.core_type<tc>, window_params = [{transform_indices = @transform_0, window_bounds = array<i64: 1, 32, 256>}, {pipeline_mode = #tpu.pipeline_mode<synchronous>, transform_indices = @transform_1, window_bounds = array<i64: 48, 32>}, {pipeline_mode = #tpu.pipeline_mode<synchronous>, transform_indices = @transform_2, window_bounds = array<i64: 48, 1>}, {transform_indices = @transform_3, window_bounds = array<i64: 1, 48, 256>}]} {
    %c0 = arith.constant 0 : index
    %c0_0 = arith.constant 0 : index
    %0 = vector.load %arg3[%c0, %c0_0] : memref<48x32xbf16, #tpu.memory_space<vmem>>, vector<48x32xbf16>
    %c0_1 = arith.constant 0 : index
    %c0_2 = arith.constant 0 : index
    %c0_3 = arith.constant 0 : index
    %1 = vector.load %arg2[%c0_1, %c0_2, %c0_3] : memref<1x32x256xbf16, #tpu.memory_space<vmem>>, vector<1x32x256xbf16>
    %2 = vector.shape_cast %1 : vector<1x32x256xbf16> to vector<32x256xbf16>
    %cst = arith.constant dense<0.000000e+00> : vector<48x256xf32>
    %3 = tpu.matmul %0, %2, %cst {dimension_numbers = #tpu.dot_dimension_numbers<[1], [0], [0], [1], [0, 0, 1, 1], [], []>} : vector<48x32xbf16>, vector<32x256xbf16>, vector<48x256xf32> -> vector<48x256xf32>
    %c0_4 = arith.constant 0 : index
    %c0_5 = arith.constant 0 : index
    %4 = vector.load %arg4[%c0_4, %c0_5] : memref<48x1xf32, #tpu.memory_space<vmem>>, vector<48x1xf32>
    %5 = vector.broadcast %4 : vector<48x1xf32> to vector<48x256xf32>
    %6 = arith.addf %3, %5 : vector<48x256xf32>
    %c0_6 = arith.constant 0 : index
    %c0_7 = arith.constant 0 : index
    %c0_8 = arith.constant 0 : index
    %7 = vector.load %arg5[%c0_6, %c0_7, %c0_8] : memref<1x48x256xf32, #tpu.memory_space<vmem>>, vector<1x48x256xf32>
    %8 = vector.shape_cast %7 : vector<1x48x256xf32> to vector<48x256xf32>
    %9 = vector.shape_cast %6 : vector<48x256xf32> to vector<1x48x256xf32>
    tpu.vector_store %arg5[%c0_6, %c0_7, %c0_8], %9 {strides = array<i32>} : memref<1x48x256xf32, #tpu.memory_space<vmem>>, vector<1x48x256xf32>,
    return
  }
  func.func @transform_0(%arg0: i32, %arg1: i32) -> (i32, i32, i32) {
    %c0_i32 = arith.constant 0 : i32
    %c0_i32_0 = arith.constant 0 : i32
    return %arg0, %c0_i32, %arg1 : i32, i32, i32
  }
  func.func @transform_1(%arg0: i32, %arg1: i32) -> (i32, i32) {
    %c0_i32 = arith.constant 0 : i32
    %c0_i32_0 = arith.constant 0 : i32
    %c0_i32_1 = arith.constant 0 : i32
    return %c0_i32, %c0_i32_0 : i32, i32
  }
  func.func @transform_2(%arg0: i32, %arg1: i32) -> (i32, i32) {
    %c0_i32 = arith.constant 0 : i32
    %c0_i32_0 = arith.constant 0 : i32
    %c0_i32_1 = arith.constant 0 : i32
    return %c0_i32, %c0_i32_0 : i32, i32
  }
  func.func @transform_3(%arg0: i32, %arg1: i32) -> (i32, i32, i32) {
    %c0_i32 = arith.constant 0 : i32
    %c0_i32_0 = arith.constant 0 : i32
    return %arg0, %c0_i32, %arg1 : i32, i32, i32
  }
}

module attributes {stable_mosaic.version = 11 : i64} {
  func.func @_conv1x1_kernel(%arg0: i32, %arg1: i32, %arg2: memref<1x32x256xbf16, #tpu.memory_space<vmem>>, %arg3: memref<48x32xbf16, #tpu.memory_space<vmem>>, %arg4: memref<48x1xf32, #tpu.memory_space<vmem>>, %arg5: memref<1x48x256xf32, #tpu.memory_space<vmem>>) attributes {dimension_semantics = [#tpu.dimension_semantics<parallel>, #tpu.dimension_semantics<parallel>], iteration_bounds = array<i64: 2, 1>, scalar_prefetch = 0 : i64, scratch_operands = 0 : i64, tpu.core_type = #tpu.core_type<tc>, window_params = [{transform_indices = @transform_0, window_bounds = array<i64: 1, 32, 256>}, {pipeline_mode = #tpu.pipeline_mode<synchronous>, transform_indices = @transform_1, window_bounds = array<i64: 48, 32>}, {pipeline_mode = #tpu.pipeline_mode<synchronous>, transform_indices = @transform_2, window_bounds = array<i64: 48, 1>}, {transform_indices = @transform_3, window_bounds = array<i64: 1, 48, 256>}]} {
    %c0 = arith.constant 0 : index
    %c0_0 = arith.constant 0 : index
    %0 = vector.load %arg3[%c0, %c0_0] : memref<48x32xbf16, #tpu.memory_space<vmem>>, vector<48x32xbf16>
    %c0_1 = arith.constant 0 : index
    %c0_2 = arith.constant 0 : index
    %c0_3 = arith.constant 0 : index
    %1 = vector.load %arg2[%c0_1, %c0_2, %c0_3] : memref<1x32x256xbf16, #tpu.memory_space<vmem>>, vector<1x32x256xbf16>
    %2 = vector.shape_cast %1 : vector<1x32x256xbf16> to vector<32x256xbf16>
    %cst = arith.constant dense<0.000000e+00> : vector<48x256xf32>
    %3 = tpu.matmul %0, %2, %cst {dimension_numbers = #tpu.dot_dimension_numbers<[1], [0], [0], [1], [0, 0, 1, 1], [], []>} : vector<48x32xbf16>, vector<32x256xbf16>, vector<48x256xf32> -> vector<48x256xf32>
    %c0_4 = arith.constant 0 : index
    %c0_5 = arith.constant 0 : index
    %4 = vector.load %arg4[%c0_4, %c0_5] : memref<48x1xf32, #tpu.memory_space<vmem>>, vector<48x1xf32>
    %5 = vector.broadcast %4 : vector<48x1xf32> to vector<48x256xf32>
    %6 = arith.addf %3, %5 : vector<48x256xf32>
    %c0_6 = arith.constant 0 : index
    %c0_7 = arith.constant 0 : index
    %c0_8 = arith.constant 0 : index
    %7 = vector.load %arg5[%c0_6, %c0_7, %c0_8] : memref<1x48x256xf32, #tpu.memory_space<vmem>>, vector<1x48x256xf32>
    %8 = vector.shape_cast %7 : vector<1x48x256xf32> to vector<48x256xf32>
    %9 = vector.shape_cast %6 : vector<48x256xf32> to vector<1x48x256xf32>
    tpu.vector_store %arg5[%c0_6, %c0_7, %c0_8], %9 {strides = array<i32>} : memref<1x48x256xf32, #tpu.memory_space<vmem>>, vector<1x48x256xf32>,
    return
  }
  func.func @transform_0(%arg0: i32, %arg1: i32) -> (i32, i32, i32) {
    %c0_i32 = arith.constant 0 : i32
    %c0_i32_0 = arith.constant 0 : i32
    return %arg0, %c0_i32, %arg1 : i32, i32, i32
  }
  func.func @transform_1(%arg0: i32, %arg1: i32) -> (i32, i32) {
    %c0_i32 = arith.constant 0 : i32
    %c0_i32_0 = arith.constant 0 : i32
    %c0_i32_1 = arith.constant 0 : i32
    return %c0_i32, %c0_i32_0 : i32, i32
  }
  func.func @transform_2(%arg0: i32, %arg1: i32) -> (i32, i32) {
    %c0_i32 = arith.constant 0 : i32
    %c0_i32_0 = arith.constant 0 : i32
    %c0_i32_1 = arith.constant 0 : i32
    return %c0_i32, %c0_i32_0 : i32, i32
  }
  func.func @transform_3(%arg0: i32, %arg1: i32) -> (i32, i32, i32) {
    %c0_i32 = arith.constant 0 : i32
    %c0_i32_0 = arith.constant 0 : i32
    return %arg0, %c0_i32, %arg1 : i32, i32, i32
  }
}

</mosaic_0001>

<bundles_post_ra>
// kernel: tpu_custom_call.1
= control target key start
LH: loop header
LB: loop body
LE: loop exit
PB: predicated region body
PF: predicated region fallthrough
CT: control target
= control target key end

     0   :  { %8 = vsyncpa [#allocation3], 0  ;;  %s823_s0 = inlined_call_operand.vmem [shape: bf16[2,32,256], index: 0, kind: input, shape index: {}]   ;;  %s824_s1 = inlined_call_operand.vmem [shape: bf16[48,32], index: 1, kind: input, shape index: {}]   ;;  %s825_s2 = inlined_call_operand.vmem [shape: f32[48,1], index: 2, kind: input, shape index: {}]   ;;  %s826_s3 = inlined_call_operand.hbm [shape: f32[2,48,256], index: 3, kind: output, shape index: {}]  }
   0x1   :  { %10 = vsyncpa [#allocation3 + $0x1], 0  ;;  %s662_s12 = smov 0   ;;  %s664_s13 = smov 0  }
   0x2   :  { %s666_s14 = smov 0   ;;  %s668_s15 = smov 0  }
   0x3   :  { %s670_s16 = smov 0   ;;  %s672_s17 = smov 0  }
   0x4 LB: > { %s462_s18 = sadd.s32 4294967295, %s636_s17   ;;  %s463_s19 = sadd.s32 4294967294, %s636_s17   ;;  %s636_s17 = sphi %s672_s17, %s16_s17   ;;  %s632_s16 = sphi %s670_s16, %s833_s16   ;;  %s628_s15 = sphi %s668_s15, %s832_s15   ;;  %s624_s14 = sphi %s666_s14, %s831_s14   ;;  %s620_s13 = sphi %s664_s13, %s830_s13   ;;  %s616_s12 = sphi %s662_s12, %s829_s12  }
   0x5   : > { %s28_s20 = sadd.s32 1, %s632_s16  ;;  %s107_s21 = sadd.s32 1, %s624_s14 }
   0x6   : > { %p30_p0 = scmp.ge.s32.totalorder %s28_s20, 2  ;;  %p117_p1 = scmp.ne.s32.totalorder %s624_s14, %s620_s13 }
   0x7   : > { %p118_p2 = scmp.eq.s32.totalorder %s462_s18, 1  ;;  %p123_p3 = scmp.ne.s32.totalorder %s620_s13, %s616_s12 }
   0x8   : > { %s835_s20 = smov (%p30_p0, %s28_s20), 0  ;;  %p124_p5 = scmp.eq.s32.totalorder %s463_s19, 1 }
   0x9   : > { %p702_p4 = por %p118_p2, %p117_p1  ;;  %s102_s23 = ssub.s32 %s632_s16, %s835_s20 }
   0xa   : > { %p466_p6 = scmp.ge.s32.totalorder %s636_s17, 1  ;;  %p105_p7 = scmp.eq.s32.totalorder %s102_s23, 0 }
   0xb   : > { %p709_p8 = por %p124_p5, %p123_p3  ;;  %p161_p9 = scmp.lt.s32.totalorder %s636_s17, 3 }
   0xc   : > { %s715_s25 = scalar_select %p105_p7, %s624_s14, %s107_s21  }
   0xd   : > { %p162_p10 = pnand %p466_p6, %p161_p9 }
   0xe   : > { %p190_p11 = scmp.lt.s32.totalorder (!%p162_p10), %s628_s15, 1  ;;  %v638_v0 = vmov (!%p162_p10), 0   ;;  %v213_v1 = vld [vmem:[%s825_s2 + $0x10] sm:$0xff] (!%p162_p10)  ;;  %v211_v2 = vld [vmem:[%s825_s2] sm:$0xff] (!%p162_p10)  ;;  %v214_v6 = vld [vmem:[%s825_s2 + $0x18] sm:$0xff] (!%p162_p10)  ;;  %vm282_vm0 = vcmask (!%p162_p10), 261120  }
   0xf   : > { %165 = sbr.rel (%p162_p10) target bundleno = 275 (0x113), region = 32  ;;  %324 = vmatprep.mubr.bf16.mxu0 (!%p162_p10), %v638_v0  ;;  %334 = vmatprep.mubr.bf16.mxu1 (!%p162_p10), %v638_v0  ;;  %v212_v7 = vld [vmem:[%s825_s2 + $0x8] sm:$0xff] (!%p162_p10)  ;;  %v555_v9 = vld [vmem:[%s824_s1] sm:$0xff] (!%p162_p10)   ;;  %v557_v13 = vld [vmem:[%s824_s1 + $0x10] sm:$0xff] (!%p162_p10)   ;;  %s186_s5 = sand.u32 (!%p162_p10), 1, %s620_s13  }
  0x10   : > { %548 = vset.pattern.permute.xlu1 (!%p162_p10), %v638_v0  ;;  %547 = vset.pattern.permute.xlu0 (!%p162_p10), %v638_v0  ;;  %v556_v10 = vld [vmem:[%s824_s1 + $0x8] sm:$0xff] (!%p162_p10)   ;;  %v215_v12 = vld [vmem:[%s825_s2 + $0x20] sm:$0xff] (!%p162_p10)  ;;  %s487_s6 = smul.u32 (!%p162_p10), 96, %s186_s5  ;;  %s639_s21 = smov (!%p162_p10), [#allocation2]  }
  0x11   : > { %229 = vperm.xlu1 (!%p162_p10), %548, %v213_v1   ;;  %219 = vperm.xlu0 (!%p162_p10), %547, %v211_v2   ;;  %v216_v11 = vld [vmem:[%s825_s2 + $0x28] sm:$0xff] (!%p162_p10)  ;;  %s488_s8 = smul.u32 (!%p162_p10), 1536, %s628_s15  ;;  %s562_s23 = sshll.u32 (!%p162_p10), %s639_s21, 4  ;;  %s563_s23 = int_to_ptr.vmem [resolvable:$false] %s562_s23 }
  0x13   : > { %s768_s18 = scalar_lea.hbm (!%p162_p10), %s826_s3, %s488_s8 }
  0x15   : > { %234 = vperm.xlu1 (!%p162_p10), %548, %v214_v6   ;;  %224 = vperm.xlu0 (!%p162_p10), %547, %v212_v7  }
  0x16   : > { %s191_s26 = scalar_select %p190_p11, %s628_s15, 1 }
  0x17   : > { %s777_s15 = scalar_lea.sflag [#allocation3], %s186_s5 }
  0x18   : > { %s482_s4 = sshll.u32 %s191_s26, 5  ;;  %s564_s26 = scalar_lea.vmem %s563_s23, 3072 }
  0x19   : > { %s197_s7 = scalar_lea.vmem %s823_s0, %s482_s4  ;;  %244 = vperm.xlu1 %548, %v216_v11   ;;  %239 = vperm.xlu0 %547, %v215_v12  }
  0x1a   : > { %v549_v3 = vld [vmem:[%s197_s7 + $0x4] ss:$8 sps:$4 sm:$0xff]   ;;  %v551_v4 = vld [vmem:[%s197_s7] ss:$8 sps:$4 sm:$0xff]   ;;  %v552_v5 = vld [vmem:[%s197_s7 + $0x14] ss:$8 sps:$4 sm:$0xff]  }
  0x1b   : > { %292 = vmatprep.subr.bf16.mxu0 %v549_v3  ;;  %483 = vmatprep.subr.bf16.mxu1 %v549_v3  ;;  %v554_v8 = vld [vmem:[%s197_s7 + $0x10] ss:$8 sps:$4 sm:$0xff]   ;;  %s752_s7 = scalar_lea.vmem [#allocation2], %s487_s6 }
  0x1c   : > { %293 = vmatpush1.bf16.msra.mxu0 %v551_v4  ;;  %485 = vmatpush1.bf16.msra.mxu1 %v551_v4  ;;  %s383_s9 = sshll.u32 %s752_s7, 4  ;;  %s770_s9 = int_to_ptr.vmem [resolvable:$true] %s383_s9 }
  0x1d   : > { %294 = vmatprep.subr.bf16.mxu0 %v552_v5  ;;  %484 = vmatprep.subr.bf16.mxu1 %v552_v5  ;;  %s558_s19 = scalar_lea.vmem %s770_s9, 1536  ;;  %p565_p1 = scmp.lt.s32.totalorder %s770_s9, %s563_s23 }
  0x1e   : > { %p559_p12 = scmp.ne.s32.totalorder %s770_s9, %s558_s19  ;;  %p566_p2 = scmp.lt.s32.totalorder %s564_s26, %s558_s19 }
  0x20   : > { %295 = vmatpush1.bf16.msra.mxu0 %v554_v8  ;;  %486 = vmatpush1.bf16.msra.mxu1 %v554_v8  ;;  %p560_p13 = pnand %p559_p12, %p702_p4  ;;  %p567_p3 = por %p566_p2, %p565_p1 }
  0x22   : > { %p561_p0 = pneg %p560_p13 }
  0x23   : > { %476 = vmatmul.mubr.msk.bf16.vlgmr.msra.gmra.mrb[0].mxu0 %vm282_vm0, %v555_v9  ;;  %477 = vmatmul.mubr.msk.bf16.vlgmr.msra.gmra.mrb[0].mxu1 %vm282_vm0, %v556_v10 }
  0x24   : > { %344 = vmatprep.mubr.bf16.mxu1 %v638_v0  ;;  %p568_p5 = pnand %p567_p3, %p561_p0 }
  0x2b   : > { %478 = vmatmul.mubr.msk.bf16.gmra.mrb[4].mxu1 %vm282_vm0, %v557_v13 }
  0x90   : > { %v230_v14 = vpop.permute.xlu1 %229  ;;  %v220_v15 = vpop.permute.xlu0 %219 }
  0x94   : > { %v235_v16 = vpop.permute.xlu1 %234  ;;  %v225_v17 = vpop.permute.xlu0 %224 }
  0x98   : > { %v240_v34 = vpop.permute.xlu0 %239  ;;  %v245_v38 = vpop.permute.xlu1 %244 }
  0xf6   : > { %v326_v18 = vpop.f32.mrb[0].mxu0  ;;  %v336_v19 = vpop.f32.mrb[0].mxu1 }
  0xf7   : > { %v327_v20 = vadd.f32 %v326_v18, %v220_v15  ;;  %v337_v21 = vadd.f32 %v336_v19, %v230_v14  ;;  %v328_v22 = vpop.f32.mrb[1].mxu0  ;;  %v338_v23 = vpop.f32.mrb[1].mxu1 }
  0xf8   : > { %v329_v24 = vadd.f32 %v328_v22, %v220_v15  ;;  %v339_v25 = vadd.f32 %v338_v23, %v230_v14  ;;  %v330_v26 = vpop.f32.mrb[2].mxu0  ;;  %v340_v27 = vpop.f32.mrb[2].mxu1 }
  0xf9   : > { %355 = vst [vmem:[%s752_s7] sm:$0xff] %v327_v20  ;;  %359 = vst [vmem:[%s752_s7 + $0x20] sm:$0xff] %v337_v21  ;;  %v331_v28 = vadd.f32 %v330_v26, %v225_v17  ;;  %v341_v29 = vadd.f32 %v340_v27, %v235_v16  ;;  %v332_v30 = vpop.f32.mrb[3].mxu0  ;;  %v342_v31 = vpop.f32.mrb[3].mxu1 }
  0xfa   : > { %356 = vst [vmem:[%s752_s7 + $0x8] sm:$0xff] %v329_v24  ;;  %360 = vst [vmem:[%s752_s7 + $0x28] sm:$0xff] %v339_v25  ;;  %v333_v32 = vadd.f32 %v332_v30, %v225_v17  ;;  %v343_v33 = vadd.f32 %v342_v31, %v235_v16 }
  0xfb   : > { %357 = vst [vmem:[%s752_s7 + $0x10] sm:$0xff] %v331_v28  ;;  %361 = vst [vmem:[%s752_s7 + $0x30] sm:$0xff] %v341_v29 }
  0xfc   : > { %358 = vst [vmem:[%s752_s7 + $0x18] sm:$0xff] %v333_v32  ;;  %362 = vst [vmem:[%s752_s7 + $0x38] sm:$0xff] %v343_v33 }
  0xfe   : > { %v346_v35 = vpop.f32.mrb[4].mxu1 }
  0xff   : > { %v347_v36 = vadd.f32 %v346_v35, %v240_v34  ;;  %v348_v37 = vpop.f32.mrb[5].mxu1 }
 0x100   : > { %v349_v39 = vadd.f32 %v348_v37, %v240_v34  ;;  %v350_v40 = vpop.f32.mrb[6].mxu1 }
 0x101   : > { %363 = vst [vmem:[%s752_s7 + $0x40] sm:$0xff] %v347_v36  ;;  %v351_v41 = vadd.f32 %v350_v40, %v245_v38  ;;  %v352_v42 = vpop.f32.mrb[7].mxu1 }
 0x102   : > { %364 = vst [vmem:[%s752_s7 + $0x48] sm:$0xff] %v349_v39  ;;  %v353_v43 = vadd.f32 %v352_v42, %v245_v38 }
 0x103   : > { %365 = vst [vmem:[%s752_s7 + $0x50] sm:$0xff] %v351_v41 }
 0x104   : > { %366 = vst [vmem:[%s752_s7 + $0x58] sm:$0xff] %v353_v43 }
 0x105   : > { %571 = shalt.err (!%p568_p5)
}
 0x106   : > { %s572_s27 = scalar_lea.hbm %s768_s18, 1536  ;;  %s576_s30 = scalar_lea.hbm %s826_s3, 3072 }
 0x107   : > { %p573_p6 = scmp.ne.s32.totalorder %s768_s18, %s572_s27  ;;  %p577_p10 = scmp.lt.u32.totalorder %s768_s18, %s826_s3 }
 0x108   : > { %p578_p11 = scmp.lt.u32.totalorder %s576_s30, %s572_s27  ;;  %p580_p13 = scmp.lt.u32.totalorder %s572_s27, %s768_s18 }
 0x109   : > { %p574_p7 = pnand %p573_p6, %p702_p4 }
 0x10a   : > { %p579_p12 = por %p578_p11, %p577_p10 }
 0x10b   : > { %p575_p9 = pneg %p574_p7 }
 0x10c   : > { %p581_p0 = por %p580_p13, %p579_p12 }
 0x10e   : > { %p582_p1 = pnand %p581_p0, %p575_p9 }
 0x110   : > { %585 = shalt.err (!%p582_p1)
}
 0x111   : > { %s640_s6 = smov 256   ;;  %s641_s7 = smov 16  }
 0x112   : > { %489 = dma.vmem_to_hbm [thread:$0]  (%p702_p4), %s770_s9, 1536, %s768_s18, %s777_s15, %s640_s6, %s640_s6, %s641_s7  }
 0x113 PF: > { %p495_p2 = scmp.ge.s32.totalorder %s636_s17, 2  ;;  %s398_s8 = sand.u32 1, %s616_s12  }
 0x114   : > { %s399_s10 = scalar_lea.sflag [#allocation3], %s398_s8 }
 0x115   : > { %p492_p3 = pnand %p495_p2, %p709_p8 }
 0x117   : > { %611 = dma.done.wait (!%p492_p3), %s399_s10, 1536  }
 0x118   : > { %613 = vsyncadd (!%p492_p3), %s399_s10, 4294965760  ;;  %s16_s17 = sadd.s32 1, %s636_s17   ;;  %s829_s12 = smov %s620_s13 }
 0x119   : > { %p13_p5 = scmp.ge.s32.totalorder %s16_s17, 4   ;;  %s830_s13 = smov %s624_s14 }
 0x11a   : > { %s831_s14 = smov %s715_s25  ;;  %s832_s15 = smov %s632_s16 }
 0x11b   : > { %s833_s16 = smov %s835_s20  ;;  %15 = sbr.rel (!%p13_p5) target bundleno = 4 (0x4), region = 67 }
 0x122   :  { %404 = vsyncpa [#allocation3], 1 }
 0x123   :  { %406 = vsyncpa [#allocation3 + $0x1], 1 }

// kernel: tpu_custom_call.1
= control target key start
LH: loop header
LB: loop body
LE: loop exit
PB: predicated region body
PF: predicated region fallthrough
CT: control target
= control target key end

     0   :  { %8 = vsyncpa [#allocation3], 0  ;;  %s823_s0 = inlined_call_operand.vmem [shape: bf16[2,32,256], index: 0, kind: input, shape index: {}]   ;;  %s824_s1 = inlined_call_operand.vmem [shape: bf16[48,32], index: 1, kind: input, shape index: {}]   ;;  %s825_s2 = inlined_call_operand.vmem [shape: f32[48,1], index: 2, kind: input, shape index: {}]   ;;  %s826_s3 = inlined_call_operand.hbm [shape: f32[2,48,256], index: 3, kind: output, shape index: {}]  }
   0x1   :  { %10 = vsyncpa [#allocation3 + $0x1], 0  ;;  %s662_s12 = smov 0   ;;  %s664_s13 = smov 0  }
   0x2   :  { %s666_s14 = smov 0   ;;  %s668_s15 = smov 0  }
   0x3   :  { %s670_s16 = smov 0   ;;  %s672_s17 = smov 0  }
   0x4 LB: > { %s462_s18 = sadd.s32 4294967295, %s636_s17   ;;  %s463_s19 = sadd.s32 4294967294, %s636_s17   ;;  %s636_s17 = sphi %s672_s17, %s16_s17   ;;  %s632_s16 = sphi %s670_s16, %s833_s16   ;;  %s628_s15 = sphi %s668_s15, %s832_s15   ;;  %s624_s14 = sphi %s666_s14, %s831_s14   ;;  %s620_s13 = sphi %s664_s13, %s830_s13   ;;  %s616_s12 = sphi %s662_s12, %s829_s12  }
   0x5   : > { %s28_s20 = sadd.s32 1, %s632_s16  ;;  %s107_s21 = sadd.s32 1, %s624_s14 }
   0x6   : > { %p30_p0 = scmp.ge.s32.totalorder %s28_s20, 2  ;;  %p117_p1 = scmp.ne.s32.totalorder %s624_s14, %s620_s13 }
   0x7   : > { %p118_p2 = scmp.eq.s32.totalorder %s462_s18, 1  ;;  %p123_p3 = scmp.ne.s32.totalorder %s620_s13, %s616_s12 }
   0x8   : > { %s835_s20 = smov (%p30_p0, %s28_s20), 0  ;;  %p124_p5 = scmp.eq.s32.totalorder %s463_s19, 1 }
   0x9   : > { %p702_p4 = por %p118_p2, %p117_p1  ;;  %s102_s23 = ssub.s32 %s632_s16, %s835_s20 }
   0xa   : > { %p466_p6 = scmp.ge.s32.totalorder %s636_s17, 1  ;;  %p105_p7 = scmp.eq.s32.totalorder %s102_s23, 0 }
   0xb   : > { %p709_p8 = por %p124_p5, %p123_p3  ;;  %p161_p9 = scmp.lt.s32.totalorder %s636_s17, 3 }
   0xc   : > { %s715_s25 = scalar_select %p105_p7, %s624_s14, %s107_s21  }
   0xd   : > { %p162_p10 = pnand %p466_p6, %p161_p9 }
   0xe   : > { %p190_p11 = scmp.lt.s32.totalorder (!%p162_p10), %s628_s15, 1  ;;  %v638_v0 = vmov (!%p162_p10), 0   ;;  %v213_v1 = vld [vmem:[%s825_s2 + $0x10] sm:$0xff] (!%p162_p10)  ;;  %v211_v2 = vld [vmem:[%s825_s2] sm:$0xff] (!%p162_p10)  ;;  %v214_v6 = vld [vmem:[%s825_s2 + $0x18] sm:$0xff] (!%p162_p10)  ;;  %vm282_vm0 = vcmask (!%p162_p10), 261120  }
   0xf   : > { %165 = sbr.rel (%p162_p10) target bundleno = 275 (0x113), region = 32  ;;  %324 = vmatprep.mubr.bf16.mxu0 (!%p162_p10), %v638_v0  ;;  %334 = vmatprep.mubr.bf16.mxu1 (!%p162_p10), %v638_v0  ;;  %v212_v7 = vld [vmem:[%s825_s2 + $0x8] sm:$0xff] (!%p162_p10)  ;;  %v555_v9 = vld [vmem:[%s824_s1] sm:$0xff] (!%p162_p10)   ;;  %v557_v13 = vld [vmem:[%s824_s1 + $0x10] sm:$0xff] (!%p162_p10)   ;;  %s186_s5 = sand.u32 (!%p162_p10), 1, %s620_s13  }
  0x10   : > { %548 = vset.pattern.permute.xlu1 (!%p162_p10), %v638_v0  ;;  %547 = vset.pattern.permute.xlu0 (!%p162_p10), %v638_v0  ;;  %v556_v10 = vld [vmem:[%s824_s1 + $0x8] sm:$0xff] (!%p162_p10)   ;;  %v215_v12 = vld [vmem:[%s825_s2 + $0x20] sm:$0xff] (!%p162_p10)  ;;  %s487_s6 = smul.u32 (!%p162_p10), 96, %s186_s5  ;;  %s639_s21 = smov (!%p162_p10), [#allocation2]  }
  0x11   : > { %229 = vperm.xlu1 (!%p162_p10), %548, %v213_v1   ;;  %219 = vperm.xlu0 (!%p162_p10), %547, %v211_v2   ;;  %v216_v11 = vld [vmem:[%s825_s2 + $0x28] sm:$0xff] (!%p162_p10)  ;;  %s488_s8 = smul.u32 (!%p162_p10), 1536, %s628_s15  ;;  %s562_s23 = sshll.u32 (!%p162_p10), %s639_s21, 4  ;;  %s563_s23 = int_to_ptr.vmem [resolvable:$false] %s562_s23 }
  0x13   : > { %s768_s18 = scalar_lea.hbm (!%p162_p10), %s826_s3, %s488_s8 }
  0x15   : > { %234 = vperm.xlu1 (!%p162_p10), %548, %v214_v6   ;;  %224 = vperm.xlu0 (!%p162_p10), %547, %v212_v7  }
  0x16   : > { %s191_s26 = scalar_select %p190_p11, %s628_s15, 1 }
  0x17   : > { %s777_s15 = scalar_lea.sflag [#allocation3], %s186_s5 }
  0x18   : > { %s482_s4 = sshll.u32 %s191_s26, 5  ;;  %s564_s26 = scalar_lea.vmem %s563_s23, 3072 }
  0x19   : > { %s197_s7 = scalar_lea.vmem %s823_s0, %s482_s4  ;;  %244 = vperm.xlu1 %548, %v216_v11   ;;  %239 = vperm.xlu0 %547, %v215_v12  }
  0x1a   : > { %v549_v3 = vld [vmem:[%s197_s7 + $0x4] ss:$8 sps:$4 sm:$0xff]   ;;  %v551_v4 = vld [vmem:[%s197_s7] ss:$8 sps:$4 sm:$0xff]   ;;  %v552_v5 = vld [vmem:[%s197_s7 + $0x14] ss:$8 sps:$4 sm:$0xff]  }
  0x1b   : > { %292 = vmatprep.subr.bf16.mxu0 %v549_v3  ;;  %483 = vmatprep.subr.bf16.mxu1 %v549_v3  ;;  %v554_v8 = vld [vmem:[%s197_s7 + $0x10] ss:$8 sps:$4 sm:$0xff]   ;;  %s752_s7 = scalar_lea.vmem [#allocation2], %s487_s6 }
  0x1c   : > { %293 = vmatpush1.bf16.msra.mxu0 %v551_v4  ;;  %485 = vmatpush1.bf16.msra.mxu1 %v551_v4  ;;  %s383_s9 = sshll.u32 %s752_s7, 4  ;;  %s770_s9 = int_to_ptr.vmem [resolvable:$true] %s383_s9 }
  0x1d   : > { %294 = vmatprep.subr.bf16.mxu0 %v552_v5  ;;  %484 = vmatprep.subr.bf16.mxu1 %v552_v5  ;;  %s558_s19 = scalar_lea.vmem %s770_s9, 1536  ;;  %p565_p1 = scmp.lt.s32.totalorder %s770_s9, %s563_s23 }
  0x1e   : > { %p559_p12 = scmp.ne.s32.totalorder %s770_s9, %s558_s19  ;;  %p566_p2 = scmp.lt.s32.totalorder %s564_s26, %s558_s19 }
  0x20   : > { %295 = vmatpush1.bf16.msra.mxu0 %v554_v8  ;;  %486 = vmatpush1.bf16.msra.mxu1 %v554_v8  ;;  %p560_p13 = pnand %p559_p12, %p702_p4  ;;  %p567_p3 = por %p566_p2, %p565_p1 }
  0x22   : > { %p561_p0 = pneg %p560_p13 }
  0x23   : > { %476 = vmatmul.mubr.msk.bf16.vlgmr.msra.gmra.mrb[0].mxu0 %vm282_vm0, %v555_v9  ;;  %477 = vmatmul.mubr.msk.bf16.vlgmr.msra.gmra.mrb[0].mxu1 %vm282_vm0, %v556_v10 }
  0x24   : > { %344 = vmatprep.mubr.bf16.mxu1 %v638_v0  ;;  %p568_p5 = pnand %p567_p3, %p561_p0 }
  0x2b   : > { %478 = vmatmul.mubr.msk.bf16.gmra.mrb[4].mxu1 %vm282_vm0, %v557_v13 }
  0x90   : > { %v230_v14 = vpop.permute.xlu1 %229  ;;  %v220_v15 = vpop.permute.xlu0 %219 }
  0x94   : > { %v235_v16 = vpop.permute.xlu1 %234  ;;  %v225_v17 = vpop.permute.xlu0 %224 }
  0x98   : > { %v240_v34 = vpop.permute.xlu0 %239  ;;  %v245_v38 = vpop.permute.xlu1 %244 }
  0xf6   : > { %v326_v18 = vpop.f32.mrb[0].mxu0  ;;  %v336_v19 = vpop.f32.mrb[0].mxu1 }
  0xf7   : > { %v327_v20 = vadd.f32 %v326_v18, %v220_v15  ;;  %v337_v21 = vadd.f32 %v336_v19, %v230_v14  ;;  %v328_v22 = vpop.f32.mrb[1].mxu0  ;;  %v338_v23 = vpop.f32.mrb[1].mxu1 }
  0xf8   : > { %v329_v24 = vadd.f32 %v328_v22, %v220_v15  ;;  %v339_v25 = vadd.f32 %v338_v23, %v230_v14  ;;  %v330_v26 = vpop.f32.mrb[2].mxu0  ;;  %v340_v27 = vpop.f32.mrb[2].mxu1 }
  0xf9   : > { %355 = vst [vmem:[%s752_s7] sm:$0xff] %v327_v20  ;;  %359 = vst [vmem:[%s752_s7 + $0x20] sm:$0xff] %v337_v21  ;;  %v331_v28 = vadd.f32 %v330_v26, %v225_v17  ;;  %v341_v29 = vadd.f32 %v340_v27, %v235_v16  ;;  %v332_v30 = vpop.f32.mrb[3].mxu0  ;;  %v342_v31 = vpop.f32.mrb[3].mxu1 }
  0xfa   : > { %356 = vst [vmem:[%s752_s7 + $0x8] sm:$0xff] %v329_v24  ;;  %360 = vst [vmem:[%s752_s7 + $0x28] sm:$0xff] %v339_v25  ;;  %v333_v32 = vadd.f32 %v332_v30, %v225_v17  ;;  %v343_v33 = vadd.f32 %v342_v31, %v235_v16 }
  0xfb   : > { %357 = vst [vmem:[%s752_s7 + $0x10] sm:$0xff] %v331_v28  ;;  %361 = vst [vmem:[%s752_s7 + $0x30] sm:$0xff] %v341_v29 }
  0xfc   : > { %358 = vst [vmem:[%s752_s7 + $0x18] sm:$0xff] %v333_v32  ;;  %362 = vst [vmem:[%s752_s7 + $0x38] sm:$0xff] %v343_v33 }
  0xfe   : > { %v346_v35 = vpop.f32.mrb[4].mxu1 }
  0xff   : > { %v347_v36 = vadd.f32 %v346_v35, %v240_v34  ;;  %v348_v37 = vpop.f32.mrb[5].mxu1 }
 0x100   : > { %v349_v39 = vadd.f32 %v348_v37, %v240_v34  ;;  %v350_v40 = vpop.f32.mrb[6].mxu1 }
 0x101   : > { %363 = vst [vmem:[%s752_s7 + $0x40] sm:$0xff] %v347_v36  ;;  %v351_v41 = vadd.f32 %v350_v40, %v245_v38  ;;  %v352_v42 = vpop.f32.mrb[7].mxu1 }
 0x102   : > { %364 = vst [vmem:[%s752_s7 + $0x48] sm:$0xff] %v349_v39  ;;  %v353_v43 = vadd.f32 %v352_v42, %v245_v38 }
 0x103   : > { %365 = vst [vmem:[%s752_s7 + $0x50] sm:$0xff] %v351_v41 }
 0x104   : > { %366 = vst [vmem:[%s752_s7 + $0x58] sm:$0xff] %v353_v43 }
 0x105   : > { %571 = shalt.err (!%p568_p5)
}
 0x106   : > { %s572_s27 = scalar_lea.hbm %s768_s18, 1536  ;;  %s576_s30 = scalar_lea.hbm %s826_s3, 3072 }
 0x107   : > { %p573_p6 = scmp.ne.s32.totalorder %s768_s18, %s572_s27  ;;  %p577_p10 = scmp.lt.u32.totalorder %s768_s18, %s826_s3 }
 0x108   : > { %p578_p11 = scmp.lt.u32.totalorder %s576_s30, %s572_s27  ;;  %p580_p13 = scmp.lt.u32.totalorder %s572_s27, %s768_s18 }
 0x109   : > { %p574_p7 = pnand %p573_p6, %p702_p4 }
 0x10a   : > { %p579_p12 = por %p578_p11, %p577_p10 }
 0x10b   : > { %p575_p9 = pneg %p574_p7 }
 0x10c   : > { %p581_p0 = por %p580_p13, %p579_p12 }
 0x10e   : > { %p582_p1 = pnand %p581_p0, %p575_p9 }
 0x110   : > { %585 = shalt.err (!%p582_p1)
}
 0x111   : > { %s640_s6 = smov 256   ;;  %s641_s7 = smov 16  }
 0x112   : > { %489 = dma.vmem_to_hbm [thread:$0]  (%p702_p4), %s770_s9, 1536, %s768_s18, %s777_s15, %s640_s6, %s640_s6, %s641_s7  }
 0x113 PF: > { %p495_p2 = scmp.ge.s32.totalorder %s636_s17, 2  ;;  %s398_s8 = sand.u32 1, %s616_s12  }
 0x114   : > { %s399_s10 = scalar_lea.sflag [#allocation3], %s398_s8 }
 0x115   : > { %p492_p3 = pnand %p495_p2, %p709_p8 }
 0x117   : > { %611 = dma.done.wait (!%p492_p3), %s399_s10, 1536  }
 0x118   : > { %613 = vsyncadd (!%p492_p3), %s399_s10, 4294965760  ;;  %s16_s17 = sadd.s32 1, %s636_s17   ;;  %s829_s12 = smov %s620_s13 }
 0x119   : > { %p13_p5 = scmp.ge.s32.totalorder %s16_s17, 4   ;;  %s830_s13 = smov %s624_s14 }
 0x11a   : > { %s831_s14 = smov %s715_s25  ;;  %s832_s15 = smov %s632_s16 }
 0x11b   : > { %s833_s16 = smov %s835_s20  ;;  %15 = sbr.rel (!%p13_p5) target bundleno = 4 (0x4), region = 67 }
 0x122   :  { %404 = vsyncpa [#allocation3], 1 }
 0x123   :  { %406 = vsyncpa [#allocation3 + $0x1], 1 }

</bundles_post_ra>
